<compile_context>
chip_gen: v7x
topology: tpu7x:2x2x1
jax: 0.10.0
libtpu: 0.0.40
codegen_flags: <defaults>
</compile_context>

<pallas_src>
import functools

import jax
import jax.numpy as jnp
from jax import lax
from jax.experimental import pallas as pl
from jax.experimental.pallas import tpu as pltpu


def _vat_fused_kernel(pos_ref, dn0_ref, w1_ref, b1_ref, w2_ref,
                      w1t_ref, w2t_ref,
                      lds_ref,
                      *, xi, eps, ip, n_total, n_out, tm, tiles_per_core):
    c = pl.program_id(0)   # core slot ("parallel")
    t = pl.program_id(1)   # row-tile loop ("arbitrary")

    # lds_ref's block index is constant across t -> VMEM-resident accumulator.
    @pl.when(t == 0)
    def _():
        lds_ref[...] = jnp.zeros_like(lds_ref)

    pos = pos_ref[...]
    w1 = w1_ref[...]
    b1 = b1_ref[...]
    w2 = w2_ref[...]
    w1t = w1t_ref[...]
    w2t = w2t_ref[...]

    def fwd(x):
        pre = jnp.dot(x, w1, preferred_element_type=jnp.float32) + b1
        h = jnp.maximum(pre, 0.0)
        # NOTE: b2 omitted -- it cancels exactly in (pred_hat - pred).
        return pre, jnp.dot(h, w2, preferred_element_type=jnp.float32)

    # pred = model(z, pos, batch)  (no grad), stays resident for this tile.
    _, pred = fwd(pos)

    # dn = rand(pos.shape) - 0.5   (geometric branch: no initial normalization)
    dn = dn0_ref[...]

    # dn.grad = grad_scale * g_x with grad_scale = 2*xi/(N*C) (global N*C!).
    # _l2_normalize(s*g) == g * s / (s*||g|| + 1e-8): fold the constant into
    # the per-row factor -> one elementwise multiply instead of three.
    grad_scale = 2.0 * xi / float(n_total * n_out)

    for _ in range(ip):   # ip is a static int
        pre = jnp.dot(pos + xi * dn, w1, preferred_element_type=jnp.float32) + b1
        h = jnp.maximum(pre, 0.0)
        yhat = jnp.dot(h, w2, preferred_element_type=jnp.float32)
        g_y = yhat - pred                                   # (unscaled) dL/dyhat
        g_h = jnp.dot(g_y, w2t, preferred_element_type=jnp.float32)
        g_pre = jnp.where(pre > 0.0, g_h, 0.0)              # ReLU backward
        g_x = jnp.dot(g_pre, w1t, preferred_element_type=jnp.float32)
        norm = jnp.sqrt(jnp.sum(g_x * g_x, axis=1, keepdims=True))
        dn = g_x * (grad_scale / (grad_scale * norm + 1e-8))

    # lds = criterion(model(z, pos + eps*dn, batch), pred)   (MSE, mean)
    _, yhat = fwd(pos + eps * dn)
    diff = yhat - pred

    if n_total % tm != 0:
        # Ragged last tile: zero contributions from padded (out-of-range) rows.
        block_idx = c * tiles_per_core + t
        row_ids = lax.broadcasted_iota(jnp.int32, (tm, 1), 0) + block_idx * tm
        diff = jnp.where(row_ids < n_total, diff, 0.0)

    inv_nc = 1.0 / float(n_total * n_out)
    lds_ref[...] += inv_nc * jnp.sum(diff * diff)


def _row_tile(n, max_tile=1024):
    """Row-tile size: full N if it fits, else a fixed multiple of 8.

    With cdiv + in-kernel masking we no longer need an exact divisor of N.
    1024 is a good default for v6e/v7x; it is also within the safe range for
    v5e (vst-slot / spill pressure grows with tm).
    """
    if n <= max_tile:
        return n
    return max(max_tile - (max_tile % 8), 8)


def vat_forward(params, z, pos, batch, noise_key, *, xi=1e-3, eps=2.5, ip=1,
                max_tile_rows=1024):
    """VATLoss.forward, 'geometric' framework, fused into one pallas_call."""
    # TODO(synk): z / batch (graph structure) are not consumed by the synthetic
    # MLP stand-in; the reference module treats the model as a black box.
    w1, b1, w2, b2 = params
    del b2  # cancels exactly in pred_hat - pred (see kernel note)

    n, din = pos.shape
    c_out = w2.shape[1]

    # dn0 ~ U[-0.5, 0.5), drawn once outside the kernel (tiling-independent,
    # and avoids the TPU-only in-kernel PRNG that has no interpret lowering).
    dn0 = jax.random.uniform(noise_key, pos.shape, jnp.float32,
                             minval=-0.5, maxval=0.5)

    # Tiny one-time transposes so the backward matmuls need no in-kernel
    # weight re-layout.
    w1t = jnp.transpose(w1)
    w2t = jnp.transpose(w2)

    tm = _row_tile(n, max_tile_rows)
    tiles_total = pl.cdiv(n, tm)
    # v7x: 2 TensorCores per chip -> split the tile loop across a "parallel"
    # leading grid axis when it divides evenly (no effect on v5e/v6e).
    # TODO(synk): odd tile counts fall back to a single parallel slot.
    num_cores = 2 if (tiles_total >= 2 and tiles_total % 2 == 0) else 1
    tiles_per_core = tiles_total // num_cores

    kern = functools.partial(
        _vat_fused_kernel, xi=float(xi), eps=float(eps), ip=int(ip),
        n_total=n, n_out=c_out, tm=tm, tiles_per_core=tiles_per_core)

    row_map = lambda c, t: (c * tiles_per_core + t, 0)
    whole = lambda c, t: (0, 0)

    out = pl.pallas_call(
        kern,
        out_shape=jax.ShapeDtypeStruct((num_cores, 1, 1), jnp.float32),
        grid=(num_cores, tiles_per_core),
        in_specs=[
            pl.BlockSpec((tm, din), row_map),      # pos row tile
            pl.BlockSpec((tm, din), row_map),      # dn0 row tile
            pl.BlockSpec(w1.shape, whole),         # W1
            pl.BlockSpec(b1.shape, whole),         # b1
            pl.BlockSpec(w2.shape, whole),         # W2
            pl.BlockSpec(w1t.shape, whole),        # W1^T
            pl.BlockSpec(w2t.shape, whole),        # W2^T
        ],
        out_specs=pl.BlockSpec((1, 1, 1), lambda c, t: (c, 0, 0)),
        compiler_params=pltpu.CompilerParams(
            # core axis parallel (megacore); tile axis accumulates -> arbitrary
            dimension_semantics=("parallel", "arbitrary"),
            vmem_limit_bytes=32 * 1024 * 1024,
        ),
    )(pos, dn0, w1, b1, w2, w1t, w2t)

    # Per-tile contributions are already scaled by 1/(N*C); just sum the
    # per-core partials.
    return jnp.sum(out)


if __name__ == "__main__":
    N, DIN, HID, C = 8, 32, 64, 16   # nodes, input feat, hidden, output classes
    key = jax.random.PRNGKey(0)
    k_w1, k_w2, k_pos, k_noise = jax.random.split(key, 4)

    # deterministic synthetic model parameters
    W1 = 0.1 * jax.random.normal(k_w1, (DIN, HID), jnp.float32)
    B1 = jnp.zeros((1, HID), jnp.float32)
    W2 = 0.1 * jax.random.normal(k_w2, (HID, C), jnp.float32)
    B2 = jnp.zeros((1, C), jnp.float32)
    params = (W1, B1, W2, B2)

    # inputs x = (z, pos, batch)
    pos = jax.random.normal(k_pos, (N, DIN), jnp.float32)
    z = jnp.zeros((N,), jnp.int32)
    batch = jnp.zeros((N,), jnp.int32)

    lds = vat_forward(params, z, pos, batch, k_noise, xi=1e-3, eps=2.5, ip=1)
    lds = jax.block_until_ready(lds)
    assert lds.shape == () and bool(jnp.isfinite(lds))

    # Pure-JAX reference of the same VAT computation (same dn0 draw).
    with jax.default_matmul_precision("float32"):
        dn0 = jax.random.uniform(k_noise, pos.shape, jnp.float32,
                                 minval=-0.5, maxval=0.5)

        def f(x):
            h = jnp.maximum(x @ W1 + B1, 0.0)
            return h @ W2 + B2

        pred = f(pos)
        dn = dn0
        for _ in range(1):
            g = jax.grad(lambda d: jnp.mean((f(pos + 1e-3 * d) - pred) ** 2))(dn)
            dn = g / (jnp.linalg.norm(g, axis=1, keepdims=True) + 1e-8)
        lds_ref = jnp.mean((f(pos + 2.5 * dn) - pred) ** 2)

    assert bool(jnp.allclose(lds, lds_ref, rtol=1e-3, atol=1e-5)), (lds, lds_ref)
    print("KERNEL_OK")
</pallas_src>

<mosaic_0001>
module attributes {stable_mosaic.version = 11 : i64} {
  func.func @_vat_fused_kernel(%arg0: i32, %arg1: i32, %arg2: memref<8x32xf32, #tpu.memory_space<vmem>>, %arg3: memref<8x32xf32, #tpu.memory_space<vmem>>, %arg4: memref<32x64xf32, #tpu.memory_space<vmem>>, %arg5: memref<1x64xf32, #tpu.memory_space<vmem>>, %arg6: memref<64x16xf32, #tpu.memory_space<vmem>>, %arg7: memref<64x32xf32, #tpu.memory_space<vmem>>, %arg8: memref<16x64xf32, #tpu.memory_space<vmem>>, %arg9: memref<1x1x1xf32, #tpu.memory_space<vmem>>) attributes {dimension_semantics = [#tpu.dimension_semantics<parallel>, #tpu.dimension_semantics<arbitrary>], iteration_bounds = array<i64: 1, 1>, scalar_prefetch = 0 : i64, scratch_operands = 0 : i64, tpu.core_type = #tpu.core_type<tc>, window_params = [{transform_indices = @transform_0, window_bounds = array<i64: 8, 32>}, {transform_indices = @transform_1, window_bounds = array<i64: 8, 32>}, {pipeline_mode = #tpu.pipeline_mode<synchronous>, transform_indices = @transform_2, window_bounds = array<i64: 32, 64>}, {pipeline_mode = #tpu.pipeline_mode<synchronous>, transform_indices = @transform_3, window_bounds = array<i64: 1, 64>}, {pipeline_mode = #tpu.pipeline_mode<synchronous>, transform_indices = @transform_4, window_bounds = array<i64: 64, 16>}, {pipeline_mode = #tpu.pipeline_mode<synchronous>, transform_indices = @transform_5, window_bounds = array<i64: 64, 32>}, {pipeline_mode = #tpu.pipeline_mode<synchronous>, transform_indices = @transform_6, window_bounds = array<i64: 16, 64>}, {transform_indices = @transform_7, window_bounds = array<i64: 1, 1, 1>}]} {
    %c0_i32 = arith.constant 0 : i32
    %0 = arith.cmpi eq, %arg1, %c0_i32 : i32
    %1 = arith.extui %0 : i1 to i32
    %c0_i32_0 = arith.constant 0 : i32
    %2 = arith.cmpi ne, %1, %c0_i32_0 : i32
    scf.if %2 {
      %cst_40 = arith.constant 0.000000e+00 : f32
      %64 = vector.broadcast %cst_40 : f32 to vector<1x1x1xf32>
      %c0_41 = arith.constant 0 : index
      %c0_42 = arith.constant 0 : index
      %c0_43 = arith.constant 0 : index
      %65 = vector.load %arg9[%c0_41, %c0_42, %c0_43] : memref<1x1x1xf32, #tpu.memory_space<vmem>>, vector<1x1x1xf32>
      tpu.vector_store %arg9[%c0_41, %c0_42, %c0_43], %64 {strides = array<i32>} : memref<1x1x1xf32, #tpu.memory_space<vmem>>, vector<1x1x1xf32>,
    } else {
    }
    %c0 = arith.constant 0 : index
    %c0_1 = arith.constant 0 : index
    %3 = vector.load %arg2[%c0, %c0_1] : memref<8x32xf32, #tpu.memory_space<vmem>>, vector<8x32xf32>
    %c0_2 = arith.constant 0 : index
    %c0_3 = arith.constant 0 : index
    %4 = vector.load %arg4[%c0_2, %c0_3] : memref<32x64xf32, #tpu.memory_space<vmem>>, vector<32x64xf32>
    %c0_4 = arith.constant 0 : index
    %c0_5 = arith.constant 0 : index
    %5 = vector.load %arg5[%c0_4, %c0_5] : memref<1x64xf32, #tpu.memory_space<vmem>>, vector<1x64xf32>
    %c0_6 = arith.constant 0 : index
    %c0_7 = arith.constant 0 : index
    %6 = vector.load %arg6[%c0_6, %c0_7] : memref<64x16xf32, #tpu.memory_space<vmem>>, vector<64x16xf32>
    %c0_8 = arith.constant 0 : index
    %c0_9 = arith.constant 0 : index
    %7 = vector.load %arg7[%c0_8, %c0_9] : memref<64x32xf32, #tpu.memory_space<vmem>>, vector<64x32xf32>
    %c0_10 = arith.constant 0 : index
    %c0_11 = arith.constant 0 : index
    %8 = vector.load %arg8[%c0_10, %c0_11] : memref<16x64xf32, #tpu.memory_space<vmem>>, vector<16x64xf32>
    %cst = arith.constant dense<0.000000e+00> : vector<8x64xf32>
    %9 = tpu.matmul %3, %4, %cst {dimension_numbers = #tpu.dot_dimension_numbers<[1], [0], [0], [1], [0, 0, 1, 1], [], []>} : vector<8x32xf32>, vector<32x64xf32>, vector<8x64xf32> -> vector<8x64xf32>
    %10 = vector.broadcast %5 : vector<1x64xf32> to vector<8x64xf32>
    %11 = arith.addf %9, %10 : vector<8x64xf32>
    %cst_12 = arith.constant 0.000000e+00 : f32
    %12 = vector.broadcast %cst_12 : f32 to vector<8x64xf32>
    %13 = arith.maximumf %11, %12 : vector<8x64xf32>
    %cst_13 = arith.constant dense<0.000000e+00> : vector<8x16xf32>
    %14 = tpu.matmul %13, %6, %cst_13 {dimension_numbers = #tpu.dot_dimension_numbers<[1], [0], [0], [1], [0, 0, 1, 1], [], []>} : vector<8x64xf32>, vector<64x16xf32>, vector<8x16xf32> -> vector<8x16xf32>
    %c0_14 = arith.constant 0 : index
    %c0_15 = arith.constant 0 : index
    %15 = vector.load %arg3[%c0_14, %c0_15] : memref<8x32xf32, #tpu.memory_space<vmem>>, vector<8x32xf32>
    %cst_16 = arith.constant 1.000000e-03 : f32
    %16 = vector.broadcast %cst_16 : f32 to vector<8x32xf32>
    %17 = arith.mulf %16, %15 : vector<8x32xf32>
    %18 = arith.addf %3, %17 : vector<8x32xf32>
    %cst_17 = arith.constant dense<0.000000e+00> : vector<8x64xf32>
    %19 = tpu.matmul %18, %4, %cst_17 {dimension_numbers = #tpu.dot_dimension_numbers<[1], [0], [0], [1], [0, 0, 1, 1], [], []>} : vector<8x32xf32>, vector<32x64xf32>, vector<8x64xf32> -> vector<8x64xf32>
    %20 = vector.broadcast %5 : vector<1x64xf32> to vector<8x64xf32>
    %21 = arith.addf %19, %20 : vector<8x64xf32>
    %cst_18 = arith.constant 0.000000e+00 : f32
    %22 = vector.broadcast %cst_18 : f32 to vector<8x64xf32>
    %23 = arith.maximumf %21, %22 : vector<8x64xf32>
    %cst_19 = arith.constant dense<0.000000e+00> : vector<8x16xf32>
    %24 = tpu.matmul %23, %6, %cst_19 {dimension_numbers = #tpu.dot_dimension_numbers<[1], [0], [0], [1], [0, 0, 1, 1], [], []>} : vector<8x64xf32>, vector<64x16xf32>, vector<8x16xf32> -> vector<8x16xf32>
    %25 = arith.subf %24, %14 : vector<8x16xf32>
    %cst_20 = arith.constant dense<0.000000e+00> : vector<8x64xf32>
    %26 = tpu.matmul %25, %8, %cst_20 {dimension_numbers = #tpu.dot_dimension_numbers<[1], [0], [0], [1], [0, 0, 1, 1], [], []>} : vector<8x16xf32>, vector<16x64xf32>, vector<8x64xf32> -> vector<8x64xf32>
    %cst_21 = arith.constant 0.000000e+00 : f32
    %27 = vector.broadcast %cst_21 : f32 to vector<8x64xf32>
    %28 = arith.cmpf ogt, %21, %27 : vector<8x64xf32>
    %cst_22 = arith.constant 0.000000e+00 : f32
    %29 = vector.broadcast %cst_22 : f32 to vector<8x64xf32>
    %30 = arith.select %28, %26, %29 : vector<8x64xi1>, vector<8x64xf32>
    %cst_23 = arith.constant dense<0.000000e+00> : vector<8x32xf32>
    %31 = tpu.matmul %30, %7, %cst_23 {dimension_numbers = #tpu.dot_dimension_numbers<[1], [0], [0], [1], [0, 0, 1, 1], [], []>} : vector<8x64xf32>, vector<64x32xf32>, vector<8x32xf32> -> vector<8x32xf32>
    %32 = arith.mulf %31, %31 : vector<8x32xf32>
    %cst_24 = arith.constant dense<0.000000e+00> : vector<8xf32>
    %33 = vector.multi_reduction <add>, %32, %cst_24 [1] : vector<8x32xf32> to vector<8xf32>
    %34 = vector.shape_cast %33 : vector<8xf32> to vector<8x1xf32>
    %35 = math.sqrt %34 : vector<8x1xf32>
    %cst_25 = arith.constant 1.562500e-05 : f32
    %36 = vector.broadcast %cst_25 : f32 to vector<8x1xf32>
    %37 = arith.mulf %36, %35 : vector<8x1xf32>
    %cst_26 = arith.constant 9.99999993E-9 : f32
    %38 = vector.broadcast %cst_26 : f32 to vector<8x1xf32>
    %39 = arith.addf %37, %38 : vector<8x1xf32>
    %cst_27 = arith.constant 1.562500e-05 : f32
    %40 = vector.broadcast %cst_27 : f32 to vector<8x1xf32>
    %41 = arith.divf %40, %39 : vector<8x1xf32>
    %42 = vector.broadcast %41 : vector<8x1xf32> to vector<8x32xf32>
    %43 = arith.mulf %31, %42 : vector<8x32xf32>
    %cst_28 = arith.constant 2.500000e+00 : f32
    %44 = vector.broadcast %cst_28 : f32 to vector<8x32xf32>
    %45 = arith.mulf %44, %43 : vector<8x32xf32>
    %46 = arith.addf %3, %45 : vector<8x32xf32>
    %cst_29 = arith.constant dense<0.000000e+00> : vector<8x64xf32>
    %47 = tpu.matmul %46, %4, %cst_29 {dimension_numbers = #tpu.dot_dimension_numbers<[1], [0], [0], [1], [0, 0, 1, 1], [], []>} : vector<8x32xf32>, vector<32x64xf32>, vector<8x64xf32> -> vector<8x64xf32>
    %48 = vector.broadcast %5 : vector<1x64xf32> to vector<8x64xf32>
    %49 = arith.addf %47, %48 : vector<8x64xf32>
    %cst_30 = arith.constant 0.000000e+00 : f32
    %50 = vector.broadcast %cst_30 : f32 to vector<8x64xf32>
    %51 = arith.maximumf %49, %50 : vector<8x64xf32>
    %cst_31 = arith.constant dense<0.000000e+00> : vector<8x16xf32>
    %52 = tpu.matmul %51, %6, %cst_31 {dimension_numbers = #tpu.dot_dimension_numbers<[1], [0], [0], [1], [0, 0, 1, 1], [], []>} : vector<8x64xf32>, vector<64x16xf32>, vector<8x16xf32> -> vector<8x16xf32>
    %53 = arith.subf %52, %14 : vector<8x16xf32>
    %c0_32 = arith.constant 0 : index
    %c0_33 = arith.constant 0 : index
    %c0_34 = arith.constant 0 : index
    %54 = vector.load %arg9[%c0_32, %c0_33, %c0_34] : memref<1x1x1xf32, #tpu.memory_space<vmem>>, vector<1x1x1xf32>
    %55 = arith.mulf %53, %53 : vector<8x16xf32>
    %56 = vector.shape_cast %55 : vector<8x16xf32> to vector<1x8x16xf32>
    %cst_35 = arith.constant dense<0.000000e+00> : vector<1xf32>
    %57 = vector.multi_reduction <add>, %56, %cst_35 [1, 2] : vector<1x8x16xf32> to vector<1xf32>
    %58 = vector.shape_cast %57 : vector<1xf32> to vector<1x1x1xf32>
    %59 = vector.extract %58[0, 0, 0] : f32 from vector<1x1x1xf32>
    %cst_36 = arith.constant 7.812500e-03 : f32
    %60 = arith.mulf %cst_36, %59 : f32
    %61 = vector.broadcast %60 : f32 to vector<1x1x1xf32>
    %62 = arith.addf %54, %61 : vector<1x1x1xf32>
    %c0_37 = arith.constant 0 : index
    %c0_38 = arith.constant 0 : index
    %c0_39 = arith.constant 0 : index
    %63 = vector.load %arg9[%c0_37, %c0_38, %c0_39] : memref<1x1x1xf32, #tpu.memory_space<vmem>>, vector<1x1x1xf32>
    tpu.vector_store %arg9[%c0_37, %c0_38, %c0_39], %62 {strides = array<i32>} : memref<1x1x1xf32, #tpu.memory_space<vmem>>, vector<1x1x1xf32>,
    return
  }
  func.func @transform_0(%arg0: i32, %arg1: i32) -> (i32, i32) {
    %c1_i32 = arith.constant 1 : i32
    %0 = arith.muli %arg0, %c1_i32 : i32
    %1 = arith.addi %0, %arg1 : i32
    %c0_i32 = arith.constant 0 : i32
    %c0_i32_0 = arith.constant 0 : i32
    return %1, %c0_i32 : i32, i32
  }
  func.func @transform_1(%arg0: i32, %arg1: i32) -> (i32, i32) {
    %c1_i32 = arith.constant 1 : i32
    %0 = arith.muli %arg0, %c1_i32 : i32
    %1 = arith.addi %0, %arg1 : i32
    %c0_i32 = arith.constant 0 : i32
    %c0_i32_0 = arith.constant 0 : i32
    return %1, %c0_i32 : i32, i32
  }
  func.func @transform_2(%arg0: i32, %arg1: i32) -> (i32, i32) {
    %c0_i32 = arith.constant 0 : i32
    %c0_i32_0 = arith.constant 0 : i32
    %c0_i32_1 = arith.constant 0 : i32
    return %c0_i32, %c0_i32_0 : i32, i32
  }
  func.func @transform_3(%arg0: i32, %arg1: i32) -> (i32, i32) {
    %c0_i32 = arith.constant 0 : i32
    %c0_i32_0 = arith.constant 0 : i32
    %c0_i32_1 = arith.constant 0 : i32
    return %c0_i32, %c0_i32_0 : i32, i32
  }
  func.func @transform_4(%arg0: i32, %arg1: i32) -> (i32, i32) {
    %c0_i32 = arith.constant 0 : i32
    %c0_i32_0 = arith.constant 0 : i32
    %c0_i32_1 = arith.constant 0 : i32
    return %c0_i32, %c0_i32_0 : i32, i32
  }
  func.func @transform_5(%arg0: i32, %arg1: i32) -> (i32, i32) {
    %c0_i32 = arith.constant 0 : i32
    %c0_i32_0 = arith.constant 0 : i32
    %c0_i32_1 = arith.constant 0 : i32
    return %c0_i32, %c0_i32_0 : i32, i32
  }
  func.func @transform_6(%arg0: i32, %arg1: i32) -> (i32, i32) {
    %c0_i32 = arith.constant 0 : i32
    %c0_i32_0 = arith.constant 0 : i32
    %c0_i32_1 = arith.constant 0 : i32
    return %c0_i32, %c0_i32_0 : i32, i32
  }
  func.func @transform_7(%arg0: i32, %arg1: i32) -> (i32, i32, i32) {
    %c0_i32 = arith.constant 0 : i32
    %c0_i32_0 = arith.constant 0 : i32
    %c0_i32_1 = arith.constant 0 : i32
    return %arg0, %c0_i32, %c0_i32_0 : i32, i32, i32
  }
}

</mosaic_0001>

<bundles_post_ra>
// kernel: tpu_custom_call.1
= control target key start
LH: loop header
LB: loop body
LE: loop exit
PB: predicated region body
PF: predicated region fallthrough
CT: control target
= control target key end

     0   :  { %v1037_v3 = vmov 0.0|0.0   ;;  %vm1038_vm0 = vmmov 0   ;;  %v1039_v6 = vmov 0.0   ;;  %s1260_s0 = inlined_call_operand.vmem [shape: f32[8,32], index: 0, kind: input, shape index: {}]   ;;  %s1261_s1 = inlined_call_operand.vmem [shape: f32[8,32], index: 1, kind: input, shape index: {}]   ;;  %s1262_s2 = inlined_call_operand.vmem [shape: f32[32,64], index: 2, kind: input, shape index: {}]   ;;  %s1263_s3 = inlined_call_operand.vmem [shape: f32[1,64], index: 3, kind: input, shape index: {}]   ;;  %s1264_s4 = inlined_call_operand.vmem [shape: f32[64,16], index: 4, kind: input, shape index: {}]   ;;  %s1265_s5 = inlined_call_operand.vmem [shape: f32[64,32], index: 5, kind: input, shape index: {}]   ;;  %s1266_s6 = inlined_call_operand.vmem [shape: f32[16,64], index: 6, kind: input, shape index: {}]   ;;  %s1267_s7 = inlined_call_operand.hbm [shape: f32[1,1,1], index: 7, kind: output, shape index: {}]  }
   0x1   :  { %v68_v0 = vld [vmem:[%s1262_s2] sm:$0xff]  ;;  %v69_v1 = vld [vmem:[%s1262_s2 + $0x8] sm:$0xff]  ;;  %v70_v2 = vld [vmem:[%s1262_s2 + $0x10] sm:$0xff]  ;;  %934 = vmatprep.subr.bf16.mxu0 %v1037_v3  ;;  %826 = vmatprep.mubr.msk.f32.mxu0 %vm1038_vm0, %v1039_v6 }
   0x2   :  { %v1091_v4 = vpack.c.bf16 %v69_v1, %v68_v0  ;;  %v71_v5 = vld [vmem:[%s1262_s2 + $0x18] sm:$0xff]  ;;  %940 = vmatprep.subr.bf16.mxu1 %v1037_v3  ;;  %v73_v7 = vld [vmem:[%s1264_s4] sm:$0xff]  ;;  %v74_v8 = vld [vmem:[%s1264_s4 + $0x8] sm:$0xff]  ;;  %845 = vmatprep.mubr.msk.f32.mxu1 %vm1038_vm0, %v1039_v6 }
   0x3   :  { %v75_v9 = vld [vmem:[%s1264_s4 + $0x10] sm:$0xff]  ;;  %v1111_v10 = vpack.c.bf16 %v71_v5, %v70_v2  ;;  %v1113_v11 = vpack.c.bf16 %v74_v8, %v73_v7  ;;  %v76_v12 = vld [vmem:[%s1264_s4 + $0x18] sm:$0xff] }
   0x4   :  { %936 = vmatpush3.bf16.msra.mxu0 %v1091_v4 }
   0x5   :  { %937 = vmatprep.subr.bf16.mxu0 %v1037_v3 }
   0x6   :  { %12 = vsyncpa [#allocation3], 0  ;;  %942 = vmatpush3.bf16.msra.mxu1 %v1113_v11  ;;  %v1120_v13 = vpack.c.bf16 %v76_v12, %v75_v9  ;;  %v77_v14 = vld [vmem:[%s1264_s4 + $0x20] sm:$0xff]  ;;  %v78_v15 = vld [vmem:[%s1264_s4 + $0x28] sm:$0xff]  ;;  %vm97_vm1 = vcmask 261120   ;;  %vm172_vm2 = vcmask 523264  }
   0x7   :  { %943 = vmatprep.subr.bf16.mxu1 %v1037_v3  ;;  %v1133_v16 = vld [vmem:[%s1260_s0] sm:$0xff]  ;;  %v1140_v18 = vpack.c.bf16 %v78_v15, %v77_v14  ;;  %v79_v21 = vld [vmem:[%s1264_s4 + $0x30] sm:$0xff]  ;;  %v80_v22 = vld [vmem:[%s1264_s4 + $0x38] sm:$0xff]  ;;  %vm397_vm3 = vcmask 130048   ;;  %vm65_vm7 = vcmask 0   ;;  %s1040_s22 = smov [#allocation2]  }
   0x8   :  { %939 = vmatpush3.bf16.msra.mxu0 %v1111_v10  ;;  %v246_v17 = vld [vmem:[%s1261_s1] sm:$0xff]  ;;  %v1169_v23 = vpack.c.bf16 %v80_v22, %v79_v21  ;;  %v90_v34 = vld [vmem:[%s1266_s6 + $0x8] sm:$0xff]  ;;  %v83_v38 = vld [vmem:[%s1265_s5 + $0x10] sm:$0xff]  ;;  %66 = vst.msk [vmem:[#allocation2] sm:$0x1] %vm65_vm7, %v1039_v6  ;;  %s735_s23 = sshll.u32 %s1040_s22, 4  ;;  %s736_s23 = int_to_ptr.vmem [resolvable:$true] %s735_s23 }
   0x9   :  { %952 = vmatprep.subr.bf16.mxu0 %v1037_v3  ;;  %v247_v19 = vmul.f32 0.001, %v246_v17  ;;  %v1178_v24 = vld [vmem:[%s1263_s3] ss:$0 sm:$0xff]  ;;  %v82_v37 = vld [vmem:[%s1265_s5 + $0x8] sm:$0xff]  ;;  %v84_v40 = vld [vmem:[%s1265_s5 + $0x18] sm:$0xff]  ;;  %p1018_p1 = scmp.lt.s32.totalorder %s736_s23, %s736_s23 }
   0xa   :  { %945 = vmatpush3.bf16.msra.mxu1 %v1120_v13  ;;  %v89_v33 = vld [vmem:[%s1266_s6] sm:$0xff]  ;;  %v977_v41 = vpack.c.bf16 %v84_v40, %v83_v38  ;;  %v86_v43 = vld [vmem:[%s1265_s5 + $0x28] sm:$0xff]  ;;  %v87_v45 = vld [vmem:[%s1265_s5 + $0x30] sm:$0xff]  ;;  %s1013_s0 = scalar_lea.vmem %s736_s23, 16  ;;  %s1017_s1 = scalar_lea.vmem %s736_s23, 32 }
   0xb   :  { %827 = vmatmul.mubr.msk.f32.vlgmr.msra.gmra.mrb[0].mxu0 %vm97_vm1, %v1133_v16  ;;  %946 = vmatprep.subr.bf16.mxu1 %v1037_v3  ;;  %v248_v20 = vadd.f32 %v247_v19, %v1133_v16  ;;  %v971_v35 = vpack.c.bf16 %v90_v34, %v89_v33  ;;  %v81_v36 = vld [vmem:[%s1265_s5] sm:$0xff]  ;;  %v88_v46 = vld [vmem:[%s1265_s5 + $0x38] sm:$0xff]  ;;  %p1014_p0 = scmp.ne.s32.totalorder %s736_s23, %s1013_s0  ;;  %p1019_p2 = scmp.lt.s32.totalorder %s1017_s1, %s1013_s0 }
   0xc   :  { %954 = vmatpush3.bf16.msra.mxu0 %v1091_v4  ;;  %856 = vmatprep.mubr.msk.f32.mxu0 %vm1038_vm0, %v1039_v6  ;;  %v974_v39 = vpack.c.bf16 %v82_v37, %v81_v36  ;;  %v85_v42 = vld [vmem:[%s1265_s5 + $0x20] sm:$0xff]  ;;  %v983_v47 = vpack.c.bf16 %v88_v46, %v87_v45 }
   0xd   :  { %955 = vmatprep.subr.bf16.mxu0 %v1037_v3  ;;  %v980_v44 = vpack.c.bf16 %v86_v43, %v85_v42  ;;  %p1020_p3 = por %p1019_p2, %p1018_p1 }
   0xe   :  { %948 = vmatpush3.bf16.msra.mxu1 %v1140_v18 }
   0xf   :  { %949 = vmatprep.subr.bf16.mxu1 %v1037_v3  ;;  %p1021_p4 = pnand %p1020_p3, %p1014_p0 }
  0x10   :  { %957 = vmatpush3.bf16.msra.mxu0 %v1111_v10 }
  0x11   :  { %958 = vmatprep.subr.bf16.mxu0 %v1037_v3 }
  0x12   :  { %951 = vmatpush3.bf16.msra.mxu1 %v1169_v23 }
  0x13   :  { %857 = vmatmul.mubr.msk.f32.vlgmr.msra.gmra.mrb[2].mxu0 %vm97_vm1, %v248_v20  ;;  %973 = vmatprep.subr.bf16.mxu1 %v1037_v3 }
  0x14   :  { %960 = vmatpush3.bf16.msra.mxu0 %v1113_v11  ;;  %875 = vmatprep.mubr.msk.f32.mxu0 %vm1038_vm0, %v1039_v6 }
  0x15   :  { %961 = vmatprep.subr.bf16.mxu0 %v1037_v3 }
  0x18   :  { %963 = vmatpush3.bf16.msra.mxu0 %v1120_v13 }
  0x19   :  { %964 = vmatprep.subr.bf16.mxu0 %v1037_v3 }
  0x1c   :  { %966 = vmatpush3.bf16.msra.mxu0 %v1140_v18 }
  0x1d   :  { %967 = vmatprep.subr.bf16.mxu0 %v1037_v3 }
  0x20   :  { %969 = vmatpush3.bf16.msra.mxu0 %v1169_v23 }
  0x21   :  { %970 = vmatprep.subr.bf16.mxu0 %v1037_v3 }
  0xde   :  { %v167_v25 = vpop.f32.mrb[0].mxu0 }
  0xdf   :  { %v168_v26 = vadd.f32 %v1178_v24, %v167_v25  ;;  %v828_v27 = vpop.f32.mrb[1].mxu0 }
  0xe1   :  { %v171_v28 = vmax.f32 %v168_v26, 0.0  ;;  %v712_v26 = vld [vmem:[#allocation2] sm:$0x1] }
  0xe3   :  { %846 = vmatmul.mubr.msk.f32.vlgmr.msra.gmra.mrb[0].mxu1 %vm172_vm2, %v171_v28 }
  0xe4   :  { %901 = vmatprep.mubr.msk.f32.mxu1 %vm1038_vm0, %v1039_v6  ;;  %975 = vmatpush3.bf16.msra.mxu1 %v974_v39 }
  0xe5   :  { %976 = vmatprep.subr.bf16.mxu1 %v1037_v3 }
  0xe6   :  { %v318_v29 = vpop.f32.mrb[2].mxu0 }
  0xe7   :  { %v319_v30 = vadd.f32 %v1178_v24, %v318_v29  ;;  %v858_v31 = vpop.f32.mrb[3].mxu0 }
  0xe8   :  { %978 = vmatpush3.bf16.msra.mxu1 %v977_v41 }
  0xe9   :  { %v322_v32 = vmax.f32 %v319_v30, 0.0  ;;  %979 = vmatprep.subr.bf16.mxu1 %v1037_v3  ;;  %vm471_vm4 = vcmp.gt.f32.partialorder %v319_v30, 0.0 }
  0xeb   :  { %876 = vmatmul.mubr.msk.f32.vlgmr.msra.gmra.mrb[4].mxu0 %vm172_vm2, %v322_v32 }
  0xec   :  { %882 = vmatprep.mubr.msk.f32.mxu0 %vm1038_vm0, %v1039_v6  ;;  %972 = vmatpush3.bf16.msra.mxu0 %v971_v35 }
  0xed   :  { %985 = vmatprep.subr.bf16.mxu0 %v1037_v3  ;;  %981 = vmatpush3.bf16.msra.mxu1 %v980_v44 }
  0xee   :  { %982 = vmatprep.subr.bf16.mxu1 %v1037_v3 }
  0xf1   :  { %984 = vmatpush3.bf16.msra.mxu1 %v983_v47 }
  0xf2   :  { %991 = vmatprep.subr.bf16.mxu1 %v1037_v3 }
 0x1b6   :  { %v242_v48 = vpop.f32.mrb[0].mxu1 }
 0x1b7   :  { %v847_v49 = vpop.f32.mrb[1].mxu1 }
 0x1be   :  { %v392_v50 = vpop.f32.mrb[4].mxu0 }
 0x1bf   :  { %v396_v51 = vsub.f32 %v392_v50, %v242_v48  ;;  %v877_v52 = vpop.f32.mrb[5].mxu0 }
 0x1c1   :  { %883 = vmatmul.mubr.msk.f32.vlgmr.msra.gmra.mrb[6].mxu0 %vm397_vm3, %v396_v51 }
 0x1c2   :  { %987 = vmatpush3.bf16.msra.mxu0 %v1091_v4  ;;  %912 = vmatprep.mubr.msk.f32.mxu0 %vm1038_vm0, %v1039_v6 }
 0x1c3   :  { %988 = vmatprep.subr.bf16.mxu0 %v1037_v3 }
 0x1c6   :  { %990 = vmatpush3.bf16.msra.mxu0 %v1111_v10 }
 0x294   :  { %v467_v53 = vpop.f32.mrb[6].mxu0 }
 0x295   :  { %v472_v54 = vsel %vm471_vm4, %v467_v53, 0.0  ;;  %v884_v55 = vpop.f32.mrb[7].mxu0 }
 0x296   :  { %902 = vmatmul.mubr.msk.f32.vlgmr.msra.gmra.mrb[2].mxu1 %vm172_vm2, %v472_v54 }
 0x297   :  { %993 = vmatpush3.bf16.msra.mxu1 %v1113_v11  ;;  %931 = vmatprep.mubr.msk.f32.mxu1 %vm1038_vm0, %v1039_v6 }
 0x298   :  { %994 = vmatprep.subr.bf16.mxu1 %v1037_v3 }
 0x29b   :  { %996 = vmatpush3.bf16.msra.mxu1 %v1120_v13 }
 0x29c   :  { %997 = vmatprep.subr.bf16.mxu1 %v1037_v3 }
 0x29f   :  { %999 = vmatpush3.bf16.msra.mxu1 %v1140_v18 }
 0x2a0   :  { %1000 = vmatprep.subr.bf16.mxu1 %v1037_v3 }
 0x2a3   :  { %1002 = vmatpush3.bf16.msra.mxu1 %v1169_v23 }
 0x369   :  { %v542_v56 = vpop.f32.mrb[2].mxu1 }
 0x36a   :  { %v903_v57 = vpop.f32.mrb[3].mxu1  ;;  %v546_v58 = vmul.f32 %v542_v56, %v542_v56 }
 0x36c   :  { %v547_v59 = vsel %vm97_vm1, %v546_v58, 0.0 }
 0x36d   :  { %548 = vadd.xlane.f32.xlu0 %v547_v59 }
 0x3fa   :  { %v549_v60 = vpop.xlane.xlu0 %548 }
 0x3fb   :  { %1009 = vrsqrt.f32 %v549_v60  ;;  %vm552_vm5 = vcmp.eq.f32.partialorder %v549_v60, inf  ;;  %v555_v63 = vand.u32 2147483648, %v549_v60  ;;  %vm554_vm6 = vcmp.eq.f32.partialorder %v549_v60, 0.0 }
 0x405   :  { %v1010_v61 = vpop.eup %1009 }
 0x406   :  { %v551_v62 = vmul.f32 %v1010_v61, %v549_v60 }
 0x408   :  { %v553_v0 = vsel %vm552_vm5, %v549_v60, %v551_v62 }
 0x409   :  { %v556_v1 = vsel %vm554_vm6, %v555_v63, %v553_v0 }
 0x40a   :  { %v557_v2 = vmul.f32 1.5625e-05, %v556_v1 }
 0x40c   :  { %v558_v4 = vadd.f32 1e-08, %v557_v2 }
 0x40e   :  { %1011 = vrcp.f32 %v558_v4 }
 0x418   :  { %v1012_v3 = vpop.eup %1011 }
 0x419   :  { %v560_v5 = vmul.f32 1.5625e-05, %v1012_v3 }
 0x41b   :  { %v561_v7 = vmul.f32 %v560_v5, %v542_v56 }
 0x41d   :  { %v562_v8 = vmul.f32 2.5, %v561_v7 }
 0x41f   :  { %v563_v9 = vadd.f32 %v562_v8, %v1133_v16 }
 0x421   :  { %913 = vmatmul.mubr.msk.f32.vlgmr.msra.gmra.mrb[8].mxu0 %vm97_vm1, %v563_v9 }
 0x4f4   :  { %v633_v10 = vpop.f32.mrb[8].mxu0 }
 0x4f5   :  { %v634_v11 = vadd.f32 %v1178_v24, %v633_v10  ;;  %v914_v12 = vpop.f32.mrb[9].mxu0 }
 0x4f7   :  { %v637_v13 = vmax.f32 %v634_v11, 0.0 }
 0x4f9   :  { %932 = vmatmul.mubr.msk.f32.vlgmr.msra.gmra.mrb[4].mxu1 %vm172_vm2, %v637_v13 }
 0x5cc   :  { %v707_v14 = vpop.f32.mrb[4].mxu1 }
 0x5cd   :  { %v711_v15 = vsub.f32 %v707_v14, %v242_v48  ;;  %v933_v17 = vpop.f32.mrb[5].mxu1 }
 0x5cf   :  { %v713_v18 = vmul.f32 %v711_v15, %v711_v15 }
 0x5d1   :  { %v714_v19 = vsel %vm397_vm3, %v713_v18, 0.0 }
 0x5d2   :  { %715 = vadd.xlane.f32.xlu0 %v714_v19 }
 0x65f   :  { %v716_v16 = vpop.xlane.xlu0 %715 }
 0x660   :  { %v717_v20 = vrot.slane %v716_v16, 4 }
 0x662   :  { %v718_v21 = vadd.f32 %v717_v20, %v716_v16 }
 0x664   :  { %v719_v22 = vrot.slane %v718_v21, 2 }
 0x666   :  { %v720_v23 = vadd.f32 %v719_v22, %v718_v21 }
 0x668   :  { %v721_v24 = vrot.slane %v720_v23, 1 }
 0x66a   :  { %v722_v25 = vadd.f32 %v721_v24, %v720_v23 }
 0x66c   :  { %1003 = vpush %v722_v25 }
 0x69d   :  { %s1004_s5 = spop %1003 }
 0x69e   :  { %s724_s21 = smul.f32 0.0078125, %s1004_s5 }
 0x6a0   :  { %v725_v27 = vstv %s724_s21 }
 0x6a1   :  { %v726_v28 = vadd.f32 %v725_v27, %v712_v26 }
 0x6a3   :  { %728 = vst.msk [vmem:[#allocation2] sm:$0x1] %vm65_vm7, %v726_v28 }
 0x6a4   :  { %1024 = shalt.err (!%p1021_p4)
}
 0x6a5   :  { %s1025_s26 = scalar_lea.hbm %s1267_s7, 16 }
 0x6a6   :  { %p1026_p5 = scmp.ne.s32.totalorder %s1267_s7, %s1025_s26  ;;  %p1029_p6 = scmp.lt.u32.totalorder %s1025_s26, %s1267_s7 }
 0x6a8   :  { %p1031_p7 = pnand %p1029_p6, %p1026_p5 }
 0x6aa   :  { %1034 = shalt.err (!%p1031_p7)
}
 0x6ab   :  { %738 = dma.vmem_to_hbm [thread:$0]  %s736_s23, 16, %s1267_s7, [#allocation3]  }
 0x6ac   :  { %1035 = dma.done.wait [#allocation3], 16  }
 0x6ad   :  { %1036 = vsyncadd [#allocation3], 4294967280 }
 0x6ae   :  { %742 = vsyncpa [#allocation3], 1 }

</bundles_post_ra>
